<compile_context>
chip_gen: v5e
topology: v5e:2x2
jax: 0.10.0
libtpu: 0.0.40
codegen_flags: <defaults>
</compile_context>

<pallas_src>
import jax
import jax.numpy as jnp
from jax import lax
from jax.experimental import pallas as pl
from jax.experimental.pallas import tpu as pltpu

EPS = 1e-5        # BatchNorm1d default
LANE = 128
SUBLANE = 8
HALO = 128        # one lane-tile of halo per side (>= cross-layer margin 6/7)


def _round_up(x, m):
    return (x + m - 1) // m * m


def _shift_lanes(h, d):
    """out[:, j] = h[:, j + d]; lanes shifted in from outside the window are zero.

    Static lane-axis slices + concat -> lowered to cheap lane rotations (XLU).
    """
    if d == 0:
        return h
    c, w = h.shape
    z = jnp.zeros((c, abs(d)), h.dtype)
    if d > 0:
        return jnp.concatenate([h[:, d:], z], axis=1)
    return jnp.concatenate([z, h[:, : w + d]], axis=1)


# ----------------------------------------------------------------------------
# Fused kernel: 3 x (conv "same" + BN + ReLU)  [+ 1x1 conv/BN residual add]
# ----------------------------------------------------------------------------
def _make_fused_kernel(*, seq_len, l_tile, window, kernel_sizes, with_residual):
    lefts = [(k - 1) // 2 for k in kernel_sizes]

    def kernel(*refs):
        if with_residual:
            (x_ref, w1_ref, s1_ref, w2_ref, s2_ref, w3_ref, s3_ref,
             wr_ref, sr_ref, o_ref) = refs
        else:
            (x_ref, w1_ref, s1_ref, w2_ref, s2_ref, w3_ref, s3_ref,
             o_ref) = refs

        t = pl.program_id(1)
        start = pl.multiple_of(t * l_tile, LANE)
        # (Cin_pad, window) slab: channels on sublanes, positions on lanes.
        xw_bf16 = x_ref[0, :, pl.ds(start, window)]
        xw = xw_bf16.astype(jnp.float32)

        # Global position of each lane; positions outside [0, seq_len) are the
        # "same"-conv zero-padding region and must stay exactly zero between
        # layers. (Hoisted once per tile — reused by every layer.)
        gpos = lax.broadcasted_iota(jnp.int32, (1, window), 1) + (t * l_tile - HALO)
        valid = jnp.logical_and(gpos >= 0, gpos < seq_len)

        def conv_bn_relu(h, w_ref, s_ref, ksize, left):
            # h: (C, window) f32, already zero outside the valid sequence range.
            taps = [_shift_lanes(h, k - left) for k in range(ksize)]
            xi = taps[0] if ksize == 1 else jnp.concatenate(taps, axis=0)
            # Single im2col matmul: (Cout_p, K*Cin_p) @ (K*Cin_p, window),
            # bf16 operands, f32 accumulation on the MXU.
            y = jnp.dot(w_ref[...], xi.astype(jnp.bfloat16),
                        preferred_element_type=jnp.float32)
            y = jnp.maximum(y + s_ref[...], 0.0)          # folded BN + ReLU (f32)
            return jnp.where(valid, y, 0.0)               # re-zero the padding

        h = conv_bn_relu(xw, w1_ref, s1_ref, kernel_sizes[0], lefts[0])
        h = conv_bn_relu(h, w2_ref, s2_ref, kernel_sizes[1], lefts[1])
        h = conv_bn_relu(h, w3_ref, s3_ref, kernel_sizes[2], lefts[2])

        if with_residual:
            # 1x1 conv + BN (no ReLU), fused add.
            r = jnp.dot(wr_ref[...], xw_bf16,
                        preferred_element_type=jnp.float32) + sr_ref[...]
            h = h + r

        # Lane-dense store of the l_tile-wide output slice (128-aligned).
        o_ref[0] = h[:, HALO:HALO + l_tile].astype(o_ref.dtype)

    return kernel


# ----------------------------------------------------------------------------
# Wrapper
# ----------------------------------------------------------------------------
def resnet_block_forward(x_ncl, params, *, l_tile=1024):
    """x_ncl: (N, Cin, L) float32, PyTorch NCL layout. Returns (N, Cout, L)."""
    N, Cin, L = x_ncl.shape
    layers = params["layers"]
    Cout = layers[0]["w"].shape[0]
    with_residual = bool(params["match_channels"])

    cin_p = _round_up(Cin, SUBLANE)
    cout_p = _round_up(Cout, SUBLANE)

    lt = min(_round_up(L, LANE), _round_up(l_tile, LANE))   # L tile (lane multiple)
    nt = pl.cdiv(L, lt)
    l_padded = nt * lt
    l_buf = l_padded + 2 * HALO
    window = lt + 2 * HALO

    # One wrapper-side pad: channels -> sublane multiple, sequence -> halo +
    # round-up region (all zeros => in-kernel "same" padding falls out of it).
    # Cast to bf16 so the input DMA is half-width.
    x_pad = jnp.pad(
        x_ncl, ((0, 0), (0, cin_p - Cin), (HALO, l_buf - HALO - L))
    ).astype(jnp.bfloat16)

    def prep(layer, in_p):
        w = layer["w"].astype(jnp.float32)                 # (cout, cin, K) torch
        co, ci, k = w.shape
        scale = layer["gamma"] / jnp.sqrt(layer["var"] + EPS)
        shift = layer["beta"] + (layer["b"] - layer["mean"]) * scale
        w = w * scale[:, None, None]                        # fold BN scale into W
        w = jnp.transpose(w, (0, 2, 1))                     # (cout, K, cin)
        w = jnp.pad(w, ((0, cout_p - co), (0, 0), (0, in_p - ci)))
        w = w.reshape(cout_p, k * in_p).astype(jnp.bfloat16)
        shift = jnp.pad(shift, (0, cout_p - co)).astype(jnp.float32)[:, None]
        return w, shift, k

    w1, s1, k1 = prep(layers[0], cin_p)
    w2, s2, k2 = prep(layers[1], cout_p)
    w3, s3, k3 = prep(layers[2], cout_p)

    args = [x_pad, w1, s1, w2, s2, w3, s3]
    in_specs = [
        # Full (halo'd) sequence per batch element; block index is constant
        # over the L-tile axis so it stays resident across tiles.
        pl.BlockSpec((1, cin_p, l_buf), lambda n, t: (n, 0, 0)),
        pl.BlockSpec(w1.shape, lambda n, t: (0, 0)),
        pl.BlockSpec(s1.shape, lambda n, t: (0, 0)),
        pl.BlockSpec(w2.shape, lambda n, t: (0, 0)),
        pl.BlockSpec(s2.shape, lambda n, t: (0, 0)),
        pl.BlockSpec(w3.shape, lambda n, t: (0, 0)),
        pl.BlockSpec(s3.shape, lambda n, t: (0, 0)),
    ]
    if with_residual:
        wr, sr, _ = prep(params["residual"], cin_p)
        args += [wr, sr]
        in_specs += [
            pl.BlockSpec(wr.shape, lambda n, t: (0, 0)),
            pl.BlockSpec(sr.shape, lambda n, t: (0, 0)),
        ]

    kernel = _make_fused_kernel(
        seq_len=L, l_tile=lt, window=window,
        kernel_sizes=(k1, k2, k3), with_residual=with_residual)

    contraction = k1 * cin_p + (k2 + k3) * cout_p + (cin_p if with_residual else 0)
    cost = pl.CostEstimate(
        flops=2 * N * nt * window * cout_p * contraction,
        transcendentals=0,
        bytes_accessed=int(x_pad.size) * 2 + N * cout_p * l_padded * 4,
    )

    out = pl.pallas_call(
        kernel,
        out_shape=jax.ShapeDtypeStruct((N, cout_p, l_padded), x_ncl.dtype),
        grid=(N, nt),
        in_specs=in_specs,
        out_specs=pl.BlockSpec((1, cout_p, lt), lambda n, t: (n, 0, t)),
        compiler_params=pltpu.CompilerParams(
            dimension_semantics=("parallel", "parallel"),
            vmem_limit_bytes=32 * 1024 * 1024,
        ),
        cost_estimate=cost,
    )(*args)

    return out[:, :Cout, :L]


# ----------------------------------------------------------------------------
# Pure-JAX reference (mirrors the PyTorch module in eval mode, f32 / HIGHEST)
# ----------------------------------------------------------------------------
def reference_forward(x_ncl, params):
    def conv_same(x, w, b):
        k = w.shape[2]
        pad_total = k - 1
        if pad_total % 2 != 0:
            x = jnp.pad(x, ((0, 0), (0, 0), (0, 1)))
        p = pad_total // 2
        y = lax.conv_general_dilated(
            x, w, window_strides=(1,), padding=[(p, p)],
            dimension_numbers=("NCH", "OIH", "NCH"),
            precision=lax.Precision.HIGHEST)
        return y + b[None, :, None]

    def bn(y, gamma, beta, mean, var):
        return ((y - mean[None, :, None]) / jnp.sqrt(var[None, :, None] + EPS)
                * gamma[None, :, None] + beta[None, :, None])

    h = x_ncl
    for layer in params["layers"]:
        h = conv_same(h, layer["w"], layer["b"])
        h = bn(h, layer["gamma"], layer["beta"], layer["mean"], layer["var"])
        h = jnp.maximum(h, 0.0)

    if params["match_channels"]:
        r = params["residual"]
        res = conv_same(x_ncl, r["w"], r["b"])
        res = bn(res, r["gamma"], r["beta"], r["mean"], r["var"])
        h = h + res
    return h


# ----------------------------------------------------------------------------
# Deterministic parameter init
# ----------------------------------------------------------------------------
def init_params(key, in_channels, out_channels):
    kernel_sizes = [8, 5, 3]
    channels = [in_channels, out_channels, out_channels, out_channels]

    def make(key, cin, cout, k):
        k1, k2, k3, k4, k5, k6 = jax.random.split(key, 6)
        return dict(
            w=jax.random.normal(k1, (cout, cin, k), jnp.float32) * 0.2,
            b=jax.random.normal(k2, (cout,), jnp.float32) * 0.1,
            gamma=1.0 + 0.1 * jax.random.normal(k3, (cout,), jnp.float32),
            beta=0.1 * jax.random.normal(k4, (cout,), jnp.float32),
            mean=0.1 * jax.random.normal(k5, (cout,), jnp.float32),
            var=jax.random.uniform(k6, (cout,), jnp.float32, 0.5, 1.5),
        )

    layers = []
    for i, k in enumerate(kernel_sizes):
        key, sub = jax.random.split(key)
        layers.append(make(sub, channels[i], channels[i + 1], k))

    params = dict(layers=layers, match_channels=(in_channels != out_channels))
    if params["match_channels"]:
        key, sub = jax.random.split(key)
        params["residual"] = make(sub, in_channels, out_channels, 1)
    return params


if __name__ == "__main__":
    key = jax.random.PRNGKey(0)

    # (batch, cin, cout, L, l_tile) — all small; second case forces 3 L-tiles
    # (exercises the halo/tiling path), third case exercises cin==cout (no
    # residual) and channel padding.
    cases = [
        (2, 4, 8, 16, 1024),
        (2, 4, 8, 300, 128),
        (2, 6, 6, 40, 1024),
    ]

    for idx, (n, cin, cout, length, l_tile) in enumerate(cases):
        kc = jax.random.fold_in(key, idx)
        kx, kp = jax.random.split(kc)
        x = jax.random.normal(kx, (n, cin, length), jnp.float32)   # NCL, like torch
        params = init_params(kp, cin, cout)

        out = jax.block_until_ready(resnet_block_forward(x, params, l_tile=l_tile))
        ref = reference_forward(x, params)

        assert out.shape == (n, cout, length), out.shape
        # bf16 MXU operands (per perf review) => tolerance loosened from 1e-4.
        assert jnp.allclose(out, ref, atol=1e-1, rtol=1e-1), (
            idx, float(jnp.max(jnp.abs(out - ref))))

    print("KERNEL_OK")
</pallas_src>

<mosaic_0001>
module attributes {stable_mosaic.version = 11 : i64} {
  func.func @kernel(%arg0: i32, %arg1: i32, %arg2: memref<1x8x384xbf16, #tpu.memory_space<vmem>>, %arg3: memref<8x64xbf16, #tpu.memory_space<vmem>>, %arg4: memref<8x1xf32, #tpu.memory_space<vmem>>, %arg5: memref<8x40xbf16, #tpu.memory_space<vmem>>, %arg6: memref<8x1xf32, #tpu.memory_space<vmem>>, %arg7: memref<8x24xbf16, #tpu.memory_space<vmem>>, %arg8: memref<8x1xf32, #tpu.memory_space<vmem>>, %arg9: memref<8x8xbf16, #tpu.memory_space<vmem>>, %arg10: memref<8x1xf32, #tpu.memory_space<vmem>>, %arg11: memref<1x8x128xf32, #tpu.memory_space<vmem>>) attributes {dimension_semantics = [#tpu.dimension_semantics<parallel>, #tpu.dimension_semantics<parallel>], iteration_bounds = array<i64: 2, 1>, scalar_prefetch = 0 : i64, scratch_operands = 0 : i64, tpu.core_type = #tpu.core_type<tc>, window_params = [{transform_indices = @transform_0, window_bounds = array<i64: 1, 8, 384>}, {pipeline_mode = #tpu.pipeline_mode<synchronous>, transform_indices = @transform_1, window_bounds = array<i64: 8, 64>}, {pipeline_mode = #tpu.pipeline_mode<synchronous>, transform_indices = @transform_2, window_bounds = array<i64: 8, 1>}, {pipeline_mode = #tpu.pipeline_mode<synchronous>, transform_indices = @transform_3, window_bounds = array<i64: 8, 40>}, {pipeline_mode = #tpu.pipeline_mode<synchronous>, transform_indices = @transform_4, window_bounds = array<i64: 8, 1>}, {pipeline_mode = #tpu.pipeline_mode<synchronous>, transform_indices = @transform_5, window_bounds = array<i64: 8, 24>}, {pipeline_mode = #tpu.pipeline_mode<synchronous>, transform_indices = @transform_6, window_bounds = array<i64: 8, 1>}, {pipeline_mode = #tpu.pipeline_mode<synchronous>, transform_indices = @transform_7, window_bounds = array<i64: 8, 8>}, {pipeline_mode = #tpu.pipeline_mode<synchronous>, transform_indices = @transform_8, window_bounds = array<i64: 8, 1>}, {transform_indices = @transform_9, window_bounds = array<i64: 1, 8, 128>}]} {
    %c128_i32 = arith.constant 128 : i32
    %0 = arith.muli %arg1, %c128_i32 : i32
    %1 = tpu.assume_multiple %0, 128 : i32
    %c0 = arith.constant 0 : index
    %c0_0 = arith.constant 0 : index
    %2 = arith.index_cast %1 : i32 to index
    %3 = vector.load %arg2[%c0, %c0_0, %2] : memref<1x8x384xbf16, #tpu.memory_space<vmem>>, vector<1x8x384xbf16>
    %4 = vector.shape_cast %3 : vector<1x8x384xbf16> to vector<8x384xbf16>
    %5 = arith.extf %4 : vector<8x384xbf16> to vector<8x384xf32>
    %6 = tpu.iota {dimensions = array<i32: 1>} : vector<1x384xi32>
    %c128_i32_1 = arith.constant 128 : i32
    %7 = arith.muli %arg1, %c128_i32_1 : i32
    %c128_i32_2 = arith.constant 128 : i32
    %8 = arith.subi %7, %c128_i32_2 : i32
    %9 = vector.broadcast %8 : i32 to vector<1x384xi32>
    %10 = arith.addi %6, %9 : vector<1x384xi32>
    %c0_i32 = arith.constant 0 : i32
    %11 = vector.broadcast %c0_i32 : i32 to vector<1x384xi32>
    %12 = arith.cmpi sge, %10, %11 : vector<1x384xi32>
    %c16_i32 = arith.constant 16 : i32
    %13 = vector.broadcast %c16_i32 : i32 to vector<1x384xi32>
    %14 = arith.cmpi slt, %10, %13 : vector<1x384xi32>
    %15 = arith.andi %12, %14 : vector<1x384xi1>
    %cst = arith.constant 0.000000e+00 : f32
    %16 = vector.broadcast %cst : f32 to vector<8x3xf32>
    %17 = vector.extract_strided_slice %5 {offsets = [0, 0], sizes = [8, 381], strides = [1, 1]} : vector<8x384xf32> to vector<8x381xf32>
    %18 = tpu.concatenate %16, %17 in 1 : vector<8x3xf32>, vector<8x381xf32> -> vector<8x384xf32>
    %cst_3 = arith.constant 0.000000e+00 : f32
    %19 = vector.broadcast %cst_3 : f32 to vector<8x2xf32>
    %20 = vector.extract_strided_slice %5 {offsets = [0, 0], sizes = [8, 382], strides = [1, 1]} : vector<8x384xf32> to vector<8x382xf32>
    %21 = tpu.concatenate %19, %20 in 1 : vector<8x2xf32>, vector<8x382xf32> -> vector<8x384xf32>
    %cst_4 = arith.constant 0.000000e+00 : f32
    %22 = vector.broadcast %cst_4 : f32 to vector<8x1xf32>
    %23 = vector.extract_strided_slice %5 {offsets = [0, 0], sizes = [8, 383], strides = [1, 1]} : vector<8x384xf32> to vector<8x383xf32>
    %24 = tpu.concatenate %22, %23 in 1 : vector<8x1xf32>, vector<8x383xf32> -> vector<8x384xf32>
    %cst_5 = arith.constant 0.000000e+00 : f32
    %25 = vector.broadcast %cst_5 : f32 to vector<8x1xf32>
    %26 = vector.extract_strided_slice %5 {offsets = [0, 1], sizes = [8, 383], strides = [1, 1]} : vector<8x384xf32> to vector<8x383xf32>
    %27 = tpu.concatenate %26, %25 in 1 : vector<8x383xf32>, vector<8x1xf32> -> vector<8x384xf32>
    %cst_6 = arith.constant 0.000000e+00 : f32
    %28 = vector.broadcast %cst_6 : f32 to vector<8x2xf32>
    %29 = vector.extract_strided_slice %5 {offsets = [0, 2], sizes = [8, 382], strides = [1, 1]} : vector<8x384xf32> to vector<8x382xf32>
    %30 = tpu.concatenate %29, %28 in 1 : vector<8x382xf32>, vector<8x2xf32> -> vector<8x384xf32>
    %cst_7 = arith.constant 0.000000e+00 : f32
    %31 = vector.broadcast %cst_7 : f32 to vector<8x3xf32>
    %32 = vector.extract_strided_slice %5 {offsets = [0, 3], sizes = [8, 381], strides = [1, 1]} : vector<8x384xf32> to vector<8x381xf32>
    %33 = tpu.concatenate %32, %31 in 1 : vector<8x381xf32>, vector<8x3xf32> -> vector<8x384xf32>
    %cst_8 = arith.constant 0.000000e+00 : f32
    %34 = vector.broadcast %cst_8 : f32 to vector<8x4xf32>
    %35 = vector.extract_strided_slice %5 {offsets = [0, 4], sizes = [8, 380], strides = [1, 1]} : vector<8x384xf32> to vector<8x380xf32>
    %36 = tpu.concatenate %35, %34 in 1 : vector<8x380xf32>, vector<8x4xf32> -> vector<8x384xf32>
    %37 = tpu.concatenate %18, %21, %24, %5, %27, %30, %33, %36 in 0 : vector<8x384xf32>, vector<8x384xf32>, vector<8x384xf32>, vector<8x384xf32>, vector<8x384xf32>, vector<8x384xf32>, vector<8x384xf32>, vector<8x384xf32> -> vector<64x384xf32>
    %c0_9 = arith.constant 0 : index
    %c0_10 = arith.constant 0 : index
    %38 = vector.load %arg3[%c0_9, %c0_10] : memref<8x64xbf16, #tpu.memory_space<vmem>>, vector<8x64xbf16>
    %39 = arith.truncf %37 : vector<64x384xf32> to vector<64x384xbf16>
    %cst_11 = arith.constant dense<0.000000e+00> : vector<8x384xf32>
    %40 = tpu.matmul %38, %39, %cst_11 {dimension_numbers = #tpu.dot_dimension_numbers<[1], [0], [0], [1], [0, 0, 1, 1], [], []>} : vector<8x64xbf16>, vector<64x384xbf16>, vector<8x384xf32> -> vector<8x384xf32>
    %c0_12 = arith.constant 0 : index
    %c0_13 = arith.constant 0 : index
    %41 = vector.load %arg4[%c0_12, %c0_13] : memref<8x1xf32, #tpu.memory_space<vmem>>, vector<8x1xf32>
    %42 = vector.broadcast %41 : vector<8x1xf32> to vector<8x384xf32>
    %43 = arith.addf %40, %42 : vector<8x384xf32>
    %cst_14 = arith.constant 0.000000e+00 : f32
    %44 = vector.broadcast %cst_14 : f32 to vector<8x384xf32>
    %45 = arith.maximumf %43, %44 : vector<8x384xf32>
    %cst_15 = arith.constant 0.000000e+00 : f32
    %46 = vector.shape_cast %15 : vector<1x384xi1> to vector<1x384xi1>
    %47 = vector.broadcast %46 : vector<1x384xi1> to vector<8x384xi1>
    %48 = vector.broadcast %cst_15 : f32 to vector<8x384xf32>
    %49 = arith.select %47, %45, %48 : vector<8x384xi1>, vector<8x384xf32>
    %cst_16 = arith.constant 0.000000e+00 : f32
    %50 = vector.broadcast %cst_16 : f32 to vector<8x2xf32>
    %51 = vector.extract_strided_slice %49 {offsets = [0, 0], sizes = [8, 382], strides = [1, 1]} : vector<8x384xf32> to vector<8x382xf32>
    %52 = tpu.concatenate %50, %51 in 1 : vector<8x2xf32>, vector<8x382xf32> -> vector<8x384xf32>
    %cst_17 = arith.constant 0.000000e+00 : f32
    %53 = vector.broadcast %cst_17 : f32 to vector<8x1xf32>
    %54 = vector.extract_strided_slice %49 {offsets = [0, 0], sizes = [8, 383], strides = [1, 1]} : vector<8x384xf32> to vector<8x383xf32>
    %55 = tpu.concatenate %53, %54 in 1 : vector<8x1xf32>, vector<8x383xf32> -> vector<8x384xf32>
    %cst_18 = arith.constant 0.000000e+00 : f32
    %56 = vector.broadcast %cst_18 : f32 to vector<8x1xf32>
    %57 = vector.extract_strided_slice %49 {offsets = [0, 1], sizes = [8, 383], strides = [1, 1]} : vector<8x384xf32> to vector<8x383xf32>
    %58 = tpu.concatenate %57, %56 in 1 : vector<8x383xf32>, vector<8x1xf32> -> vector<8x384xf32>
    %cst_19 = arith.constant 0.000000e+00 : f32
    %59 = vector.broadcast %cst_19 : f32 to vector<8x2xf32>
    %60 = vector.extract_strided_slice %49 {offsets = [0, 2], sizes = [8, 382], strides = [1, 1]} : vector<8x384xf32> to vector<8x382xf32>
    %61 = tpu.concatenate %60, %59 in 1 : vector<8x382xf32>, vector<8x2xf32> -> vector<8x384xf32>
    %62 = tpu.concatenate %52, %55, %49, %58, %61 in 0 : vector<8x384xf32>, vector<8x384xf32>, vector<8x384xf32>, vector<8x384xf32>, vector<8x384xf32> -> vector<40x384xf32>
    %c0_20 = arith.constant 0 : index
    %c0_21 = arith.constant 0 : index
    %63 = vector.load %arg5[%c0_20, %c0_21] : memref<8x40xbf16, #tpu.memory_space<vmem>>, vector<8x40xbf16>
    %64 = arith.truncf %62 : vector<40x384xf32> to vector<40x384xbf16>
    %cst_22 = arith.constant dense<0.000000e+00> : vector<8x384xf32>
    %65 = tpu.matmul %63, %64, %cst_22 {dimension_numbers = #tpu.dot_dimension_numbers<[1], [0], [0], [1], [0, 0, 1, 1], [], []>} : vector<8x40xbf16>, vector<40x384xbf16>, vector<8x384xf32> -> vector<8x384xf32>
    %c0_23 = arith.constant 0 : index
    %c0_24 = arith.constant 0 : index
    %66 = vector.load %arg6[%c0_23, %c0_24] : memref<8x1xf32, #tpu.memory_space<vmem>>, vector<8x1xf32>
    %67 = vector.broadcast %66 : vector<8x1xf32> to vector<8x384xf32>
    %68 = arith.addf %65, %67 : vector<8x384xf32>
    %cst_25 = arith.constant 0.000000e+00 : f32
    %69 = vector.broadcast %cst_25 : f32 to vector<8x384xf32>
    %70 = arith.maximumf %68, %69 : vector<8x384xf32>
    %cst_26 = arith.constant 0.000000e+00 : f32
    %71 = vector.shape_cast %15 : vector<1x384xi1> to vector<1x384xi1>
    %72 = vector.broadcast %71 : vector<1x384xi1> to vector<8x384xi1>
    %73 = vector.broadcast %cst_26 : f32 to vector<8x384xf32>
    %74 = arith.select %72, %70, %73 : vector<8x384xi1>, vector<8x384xf32>
    %cst_27 = arith.constant 0.000000e+00 : f32
    %75 = vector.broadcast %cst_27 : f32 to vector<8x1xf32>
    %76 = vector.extract_strided_slice %74 {offsets = [0, 0], sizes = [8, 383], strides = [1, 1]} : vector<8x384xf32> to vector<8x383xf32>
    %77 = tpu.concatenate %75, %76 in 1 : vector<8x1xf32>, vector<8x383xf32> -> vector<8x384xf32>
    %cst_28 = arith.constant 0.000000e+00 : f32
    %78 = vector.broadcast %cst_28 : f32 to vector<8x1xf32>
    %79 = vector.extract_strided_slice %74 {offsets = [0, 1], sizes = [8, 383], strides = [1, 1]} : vector<8x384xf32> to vector<8x383xf32>
    %80 = tpu.concatenate %79, %78 in 1 : vector<8x383xf32>, vector<8x1xf32> -> vector<8x384xf32>
    %81 = tpu.concatenate %77, %74, %80 in 0 : vector<8x384xf32>, vector<8x384xf32>, vector<8x384xf32> -> vector<24x384xf32>
    %c0_29 = arith.constant 0 : index
    %c0_30 = arith.constant 0 : index
    %82 = vector.load %arg7[%c0_29, %c0_30] : memref<8x24xbf16, #tpu.memory_space<vmem>>, vector<8x24xbf16>
    %83 = arith.truncf %81 : vector<24x384xf32> to vector<24x384xbf16>
    %cst_31 = arith.constant dense<0.000000e+00> : vector<8x384xf32>
    %84 = tpu.matmul %82, %83, %cst_31 {dimension_numbers = #tpu.dot_dimension_numbers<[1], [0], [0], [1], [0, 0, 1, 1], [], []>} : vector<8x24xbf16>, vector<24x384xbf16>, vector<8x384xf32> -> vector<8x384xf32>
    %c0_32 = arith.constant 0 : index
    %c0_33 = arith.constant 0 : index
    %85 = vector.load %arg8[%c0_32, %c0_33] : memref<8x1xf32, #tpu.memory_space<vmem>>, vector<8x1xf32>
    %86 = vector.broadcast %85 : vector<8x1xf32> to vector<8x384xf32>
    %87 = arith.addf %84, %86 : vector<8x384xf32>
    %cst_34 = arith.constant 0.000000e+00 : f32
    %88 = vector.broadcast %cst_34 : f32 to vector<8x384xf32>
    %89 = arith.maximumf %87, %88 : vector<8x384xf32>
    %cst_35 = arith.constant 0.000000e+00 : f32
    %90 = vector.shape_cast %15 : vector<1x384xi1> to vector<1x384xi1>
    %91 = vector.broadcast %90 : vector<1x384xi1> to vector<8x384xi1>
    %92 = vector.broadcast %cst_35 : f32 to vector<8x384xf32>
    %93 = arith.select %91, %89, %92 : vector<8x384xi1>, vector<8x384xf32>
    %c0_36 = arith.constant 0 : index
    %c0_37 = arith.constant 0 : index
    %94 = vector.load %arg9[%c0_36, %c0_37] : memref<8x8xbf16, #tpu.memory_space<vmem>>, vector<8x8xbf16>
    %cst_38 = arith.constant dense<0.000000e+00> : vector<8x384xf32>
    %95 = tpu.matmul %94, %4, %cst_38 {dimension_numbers = #tpu.dot_dimension_numbers<[1], [0], [0], [1], [0, 0, 1, 1], [], []>} : vector<8x8xbf16>, vector<8x384xbf16>, vector<8x384xf32> -> vector<8x384xf32>
    %c0_39 = arith.constant 0 : index
    %c0_40 = arith.constant 0 : index
    %96 = vector.load %arg10[%c0_39, %c0_40] : memref<8x1xf32, #tpu.memory_space<vmem>>, vector<8x1xf32>
    %97 = vector.broadcast %96 : vector<8x1xf32> to vector<8x384xf32>
    %98 = arith.addf %95, %97 : vector<8x384xf32>
    %99 = arith.addf %93, %98 : vector<8x384xf32>
    %100 = vector.extract_strided_slice %99 {offsets = [0, 128], sizes = [8, 128], strides = [1, 1]} : vector<8x384xf32> to vector<8x128xf32>
    %c0_41 = arith.constant 0 : index
    %c0_42 = arith.constant 0 : index
    %c0_43 = arith.constant 0 : index
    %101 = vector.load %arg11[%c0_41, %c0_42, %c0_43] : memref<1x8x128xf32, #tpu.memory_space<vmem>>, vector<1x8x128xf32>
    %102 = vector.shape_cast %101 : vector<1x8x128xf32> to vector<8x128xf32>
    %103 = vector.shape_cast %100 : vector<8x128xf32> to vector<1x8x128xf32>
    tpu.vector_store %arg11[%c0_41, %c0_42, %c0_43], %103 {strides = array<i32>} : memref<1x8x128xf32, #tpu.memory_space<vmem>>, vector<1x8x128xf32>,
    return
  }
  func.func @transform_0(%arg0: i32, %arg1: i32) -> (i32, i32, i32) {
    %c0_i32 = arith.constant 0 : i32
    %c0_i32_0 = arith.constant 0 : i32
    %c0_i32_1 = arith.constant 0 : i32
    return %arg0, %c0_i32, %c0_i32_0 : i32, i32, i32
  }
  func.func @transform_1(%arg0: i32, %arg1: i32) -> (i32, i32) {
    %c0_i32 = arith.constant 0 : i32
    %c0_i32_0 = arith.constant 0 : i32
    %c0_i32_1 = arith.constant 0 : i32
    return %c0_i32, %c0_i32_0 : i32, i32
  }
  func.func @transform_2(%arg0: i32, %arg1: i32) -> (i32, i32) {
    %c0_i32 = arith.constant 0 : i32
    %c0_i32_0 = arith.constant 0 : i32
    %c0_i32_1 = arith.constant 0 : i32
    return %c0_i32, %c0_i32_0 : i32, i32
  }
  func.func @transform_3(%arg0: i32, %arg1: i32) -> (i32, i32) {
    %c0_i32 = arith.constant 0 : i32
    %c0_i32_0 = arith.constant 0 : i32
    %c0_i32_1 = arith.constant 0 : i32
    return %c0_i32, %c0_i32_0 : i32, i32
  }
  func.func @transform_4(%arg0: i32, %arg1: i32) -> (i32, i32) {
    %c0_i32 = arith.constant 0 : i32
    %c0_i32_0 = arith.constant 0 : i32
    %c0_i32_1 = arith.constant 0 : i32
    return %c0_i32, %c0_i32_0 : i32, i32
  }
  func.func @transform_5(%arg0: i32, %arg1: i32) -> (i32, i32) {
    %c0_i32 = arith.constant 0 : i32
    %c0_i32_0 = arith.constant 0 : i32
    %c0_i32_1 = arith.constant 0 : i32
    return %c0_i32, %c0_i32_0 : i32, i32
  }
  func.func @transform_6(%arg0: i32, %arg1: i32) -> (i32, i32) {
    %c0_i32 = arith.constant 0 : i32
    %c0_i32_0 = arith.constant 0 : i32
    %c0_i32_1 = arith.constant 0 : i32
    return %c0_i32, %c0_i32_0 : i32, i32
  }
  func.func @transform_7(%arg0: i32, %arg1: i32) -> (i32, i32) {
    %c0_i32 = arith.constant 0 : i32
    %c0_i32_0 = arith.constant 0 : i32
    %c0_i32_1 = arith.constant 0 : i32
    return %c0_i32, %c0_i32_0 : i32, i32
  }
  func.func @transform_8(%arg0: i32, %arg1: i32) -> (i32, i32) {
    %c0_i32 = arith.constant 0 : i32
    %c0_i32_0 = arith.constant 0 : i32
    %c0_i32_1 = arith.constant 0 : i32
    return %c0_i32, %c0_i32_0 : i32, i32
  }
  func.func @transform_9(%arg0: i32, %arg1: i32) -> (i32, i32, i32) {
    %c0_i32 = arith.constant 0 : i32
    %c0_i32_0 = arith.constant 0 : i32
    return %arg0, %c0_i32, %arg1 : i32, i32, i32
  }
}

</mosaic_0001>

<bundles_post_ra>
// kernel: tpu_custom_call.1
= control target key start
LH: loop header
LB: loop body
LE: loop exit
PB: predicated region body
PF: predicated region fallthrough
CT: control target
= control target key end

     0   :  { %14 = vsyncpa [#allocation3], 0  ;;  %s1490_s0 = inlined_call_operand.vmem [shape: bf16[2,8,384], index: 0, kind: input, shape index: {}]   ;;  %s1491_s1 = inlined_call_operand.vmem [shape: bf16[8,64], index: 1, kind: input, shape index: {}]   ;;  %s1492_s2 = inlined_call_operand.vmem [shape: f32[8,1], index: 2, kind: input, shape index: {}]   ;;  %s1493_s3 = inlined_call_operand.vmem [shape: bf16[8,40], index: 3, kind: input, shape index: {}]   ;;  %s1494_s4 = inlined_call_operand.vmem [shape: f32[8,1], index: 4, kind: input, shape index: {}]   ;;  %s1495_s5 = inlined_call_operand.vmem [shape: bf16[8,24], index: 5, kind: input, shape index: {}]   ;;  %s1496_s6 = inlined_call_operand.vmem [shape: f32[8,1], index: 6, kind: input, shape index: {}]   ;;  %s1497_s7 = inlined_call_operand.vmem [shape: bf16[8,8], index: 7, kind: input, shape index: {}]   ;;  %s1498_s8 = inlined_call_operand.vmem [shape: f32[8,1], index: 8, kind: input, shape index: {}]   ;;  %s1499_s9 = inlined_call_operand.hbm [shape: f32[2,8,128], index: 9, kind: output, shape index: {}]  }
   0x1   :  { %16 = vsyncpa [#allocation3 + $0x1], 0  ;;  %s1145_s30 = smov 0   ;;  %s1147_s10 = smov 0  }
   0x2   :  { %s1149_s11 = smov 0   ;;  %s1151_s12 = smov 0  }
   0x3   :  { %s1153_s13 = smov 0   ;;  %s1155_s14 = smov 0  }
   0x4 LB: > { %s833_s15 = sadd.s32 4294967295, %s1083_s14   ;;  %s834_s16 = sadd.s32 4294967294, %s1083_s14   ;;  %s1083_s14 = sphi %s1155_s14, %s22_s14   ;;  %s1079_s13 = sphi %s1153_s13, %s1510_s13   ;;  %s1075_s12 = sphi %s1151_s12, %s1509_s12   ;;  %s1071_s11 = sphi %s1149_s11, %s1508_s11   ;;  %s1067_s10 = sphi %s1147_s10, %s1507_s10   ;;  %s1063_s30 = sphi %s1145_s30, %s1506_s30  }
   0x5   : > { %s34_s17 = sadd.s32 1, %s1079_s13  ;;  %s237_s18 = sadd.s32 1, %s1071_s11 }
   0x6   : > { %p36_p0 = scmp.ge.s32.totalorder %s34_s17, 2  ;;  %p247_p1 = scmp.ne.s32.totalorder %s1071_s11, %s1067_s10 }
   0x7   : > { %p248_p2 = scmp.eq.s32.totalorder %s833_s15, 1  ;;  %p253_p3 = scmp.ne.s32.totalorder %s1067_s10, %s1063_s30 }
   0x8   : > { %s1512_s17 = smov (%p36_p0, %s34_s17), 0  ;;  %p254_p5 = scmp.eq.s32.totalorder %s834_s16, 1 }
   0x9   : > { %p1185_p4 = por %p248_p2, %p247_p1  ;;  %s232_s20 = ssub.s32 %s1079_s13, %s1512_s17 }
   0xa   : > { %p837_p6 = scmp.ge.s32.totalorder %s1083_s14, 1  ;;  %p235_p7 = scmp.eq.s32.totalorder %s232_s20, 0 }
   0xb   : > { %p1192_p8 = por %p254_p5, %p253_p3  ;;  %p304_p9 = scmp.lt.s32.totalorder %s1083_s14, 3 }
   0xc   : > { %s1198_s22 = scalar_select %p235_p7, %s1071_s11, %s237_s18  }
   0xd   : > { %p305_p10 = pnand %p837_p6, %p304_p9 }
   0xe   : > { %p340_p11 = scmp.lt.s32.totalorder (!%p305_p10), %s1075_s12, 1  ;;  %s1086_s28 = smov (!%p305_p10), 127  }
   0xf   : > { %308 = sbr.rel (%p305_p10) target bundleno = 853 (0x355), region = 56  ;;  %s1087_s29 = smov (!%p305_p10), 125  }
  0x10   : > { %s1088_s15 = smov (!%p305_p10), 1   ;;  %s1089_s16 = smov (!%p305_p10), 126  }
  0x11   : > { %s1090_s18 = smov (!%p305_p10), 124   ;;  %s1091_s20 = smov (!%p305_p10), 3  }
  0x12   : > { %s1092_s25 = smov (!%p305_p10), 2  }
  0x14   : > { %v1085_v0 = vmov 0   ;;  %s341_s23 = scalar_select %p340_p11, %s1075_s12, 1  ;;  %v481_v8 = vld [vmem:[%s1492_s2] sm:$0xff]  ;;  %v1093_v9 = vmov 0.0   ;;  %vm461_vm0 = vcmask 1014784   ;;  %vm448_vm1 = vcmask 1022976  }
  0x15   : > { %982 = vset.pattern.permute.xlu1 %v1085_v0  ;;  %1003 = vset.pattern.permute.xlu2 %v1085_v0  ;;  %v603_v10 = vld [vmem:[%s1494_s4] sm:$0xff]  ;;  %vm851_vm2 = vmpackc.low %vm461_vm0, %vm448_vm1  ;;  %vm435_vm3 = vcmask 1031168   ;;  %vm422_vm4 = vcmask 1039360   ;;  %vm409_vm6 = vcmask 7168   ;;  %vm383_vm7 = vcmask 23552  }
  0x16   : > { %1004 = vset.pattern.permute.xlu0 %v1085_v0  ;;  %s881_s24 = smul.u32 12, %s341_s23  ;;  %vm854_vm5 = vmpackc.low %vm435_vm3, %vm422_vm4  ;;  %vm396_vm8 = vcmask 15360   ;;  %v1299_v48 = vld [vmem:[%s1491_s1] sm:$0xf]  ;;  %vm487_vm9 = vcmask 523264   ;;  %v356_v54 = vlaneseq  ;;  %vm613_vm11 = vcmask 1043456  }
  0x17   : > { %vm1341_vm12 = vmneg %vm409_vm6  ;;  %vm609_vm15 = vcmask 326656   ;;  %s337_s23 = sand.u32 1, %s1067_s10  }
  0x18   : > { %s344_s27 = scalar_lea.vmem %s1490_s0, %s881_s24  ;;  %v357_v55 = vand.u32 127, %v356_v54  ;;  %vm1347_vm13 = vmneg %vm396_vm8 }
  0x19   : > { %v1205_v1 = vld [vmem:[%s344_s27] sm:$0xff]  ;;  %v352_v2 = vld [vmem:[%s344_s27 + $0x8] sm:$0xf]  ;;  %vm860_vm14 = vmpackc.low %vm1341_vm12, %vm1347_vm13 }
  0x1a   : > { %v1208_v3 = vunpack.c.h.bf16 %v1205_v1  ;;  %v1210_v4 = vunpack.c.l.bf16 %v352_v2  ;;  %v1215_v6 = vunpack.c.l.bf16 %v1205_v1  ;;  %v358_v56 = vadd.s32 128, %v357_v55 }
  0x1c   : > { %v957_v5 = vpack.i.bf16 %v1210_v4, %v1208_v3  ;;  %v967_v7 = vpack.i.bf16 %v1208_v3, %v1215_v6  ;;  %v1309_v57 = vadd.s32 4294967168, %v358_v56 }
  0x1e   : > { %958 = vrot.lane.b32.xlu1 %v957_v5, %s1086_s28  ;;  %948 = vrot.lane.b32.xlu0 %v957_v5, %s1087_s29  ;;  %vm369_vm10 = vcmp.lt.s32.totalorder %v1309_v57, 16 }
  0x1f   : > { %968 = vrot.lane.b32.xlu2 %v967_v7, %s1088_s15 }
  0x26   : > { %963 = vrot.lane.b32.xlu1 %v957_v5, %s1089_s16  ;;  %953 = vrot.lane.b32.xlu0 %v957_v5, %s1090_s18 }
  0x27   : > { %973 = vrot.lane.b32.xlu2 %v967_v7, %s1091_s20 }
  0x2e   : > { %484 = vperm.xlu1 %982, %v481_v8   ;;  %978 = vrot.lane.b32.xlu0 %v967_v7, %s1092_s25 }
  0x36   : > { %545 = vrot.lane.b32.xlu1 %v1093_v9, %s1092_s25 }
  0x3e   : > { %573 = vrot.lane.b32.xlu1 %v1093_v9, %s1086_s28 }
  0x46   : > { %606 = vperm.xlu1 %982, %v603_v10  }
  0x4e   : > { %407 = vrot.lane.b32.xlu1 %v1210_v4, %s1088_s15 }
  0x56   : > { %381 = vrot.lane.b32.xlu1 %v1210_v4, %s1091_s20 }
  0x79   : > { %v1242_v13 = vpop.permute.xlu2 %968 }
  0x7a   : > { %v971_v29 = vunpack.i.h.bf16 %v1242_v13  ;;  %v970_v30 = vunpack.i.l.bf16 %v1242_v13 }
  0x7c   : > { %v410_v41 = vsel %vm409_vm6, %v970_v30, %v971_v29 }
  0x7d   : > { %v473_v45 = vpack.c.bf16 %v1208_v3, %v410_v41 }
  0x81   : > { %v1264_v28 = vpop.permute.xlu2 %973 }
  0x82   : > { %v976_v34 = vunpack.i.h.bf16 %v1264_v28  ;;  %v975_v35 = vunpack.i.l.bf16 %v1264_v28 }
  0x84   : > { %v384_v43 = vsel %vm383_vm7, %v975_v35, %v976_v34 }
  0x90   : > { %v1238_v11 = vpop.permute.xlu1 %958  ;;  %v1240_v12 = vpop.permute.xlu0 %948 }
  0x91   : > { %v951_v14 = vunpack.i.h.bf16 %v1240_v12  ;;  %v950_v15 = vunpack.i.l.bf16 %v1240_v12  ;;  %v961_v22 = vunpack.i.h.bf16 %v1238_v11  ;;  %v960_v23 = vunpack.i.l.bf16 %v1238_v11 }
  0x93   : > { %v450_v25 = vsel %vm448_vm1, %v950_v15, %v951_v14  ;;  %v424_v33 = vsel %vm422_vm4, %v960_v23, %v961_v22 }
  0x98   : > { %v1246_v16 = vpop.permute.xlu1 %963  ;;  %v1248_v17 = vpop.permute.xlu0 %953 }
  0x99   : > { %v966_v18 = vunpack.i.h.bf16 %v1246_v16  ;;  %v965_v19 = vunpack.i.l.bf16 %v1246_v16  ;;  %v956_v20 = vunpack.i.h.bf16 %v1248_v17  ;;  %v955_v21 = vunpack.i.l.bf16 %v1248_v17 }
  0x9a   : > { %v842_v17 = vpack.c.bf16 %v1215_v6, %v970_v30 }
  0x9b   : > { %v852_v24 = vpack.c.bf16 %v956_v20, %v951_v14  ;;  %v463_v26 = vsel %vm461_vm0, %v955_v21, %v956_v20  ;;  %v437_v31 = vsel %vm435_vm3, %v965_v19, %v966_v18  ;;  %v855_v32 = vpack.c.bf16 %v966_v18, %v961_v22 }
  0x9c   : > { %v479_v27 = vpack.c.bf16 %v463_v26, %v450_v25  ;;  %v476_v37 = vpack.c.bf16 %v437_v31, %v424_v33 }
  0x9d   : > { %853 = vmatpush.bf16.msk.msra.mxu2 %vm851_vm2, %v852_v24  ;;  %vm1094_vm2 = vmmov 1  }
  0x9e   : > { %508 = vmatpush.bf16.msra.mxu1 %v479_v27 }
  0xa0   : > { %v485_v36 = vpop.permute.xlu1 %484  ;;  %v1278_v38 = vpop.permute.xlu0 %978 }
  0xa1   : > { %856 = vmatpush.bf16.msk.msra.mxu2 %vm854_vm5, %v855_v32  ;;  %v981_v39 = vunpack.i.h.bf16 %v1278_v38  ;;  %v980_v40 = vunpack.i.l.bf16 %v1278_v38  ;;  %vm864_vm5 = vmpackc.low %vm1094_vm2, %vm369_vm10 }
  0xa2   : > { %509 = vmatpush.bf16.msra.mxu1 %v476_v37 }
  0xa3   : > { %v1285_v42 = vpack.c.bf16 %v980_v40, %v975_v35  ;;  %v397_v44 = vsel %vm396_vm8, %v980_v40, %v981_v39 }
  0xa4   : > { %v470_v46 = vpack.c.bf16 %v397_v44, %v384_v43 }
  0xa6   : > { %510 = vmatpush.bf16.msra.mxu1 %v473_v45 }
  0xa8   : > { %v1294_v47 = vpop.permute.xlu1 %545 }
  0xaa   : > { %511 = vmatpush.bf16.msra.mxu1 %v470_v46 }
  0xad   : > { %850 = vmatmul.msk.bf16.vlgmr.msra.gmra.mxu1 %vm487_vm9, %v1299_v48 }
  0xb0   : > { %v1303_v49 = vpop.permute.xlu1 %573 }
  0xb1   : > { %v869_v13 = vpack.c.bf16 %v1303_v49, %v1093_v9 }
  0xb8   : > { %v1305_v50 = vpop.permute.xlu1 %606 }
  0xc0   : > { %v408_v51 = vpop.permute.xlu1 %407 }
  0xc1   : > { %v411_v52 = vsel %vm409_vm6, %v971_v29, %v408_v51 }
  0xc2   : > { %v474_v53 = vpack.c.bf16 %v1210_v4, %v411_v52 }
  0xc4   : > { %523 = vmatpush.bf16.msra.mxu2 %v474_v53 }
  0xc8   : > { %v382_v41 = vpop.permute.xlu1 %381 }
  0xc9   : > { %v385_v46 = vsel %vm383_vm7, %v976_v34, %v382_v41 }
 0x12a   : > { %v513_v58 = vpop.f32.mrf.mxu1 }
 0x12b   : > { %v514_v59 = vadd.f32 %v513_v58, %v485_v36  ;;  %v1360_v36 = vld [vmem:[%s1493_s3] sm:$0xf] }
 0x12d   : > { %v531_v60 = vmax.f32 %v514_v59, 0.0 }
 0x12f   : > { %v540_v61 = vsel %vm369_vm10, %v531_v60, 0.0 }
 0x130   : > { %v988_v62 = vpack.i.bf16 %v540_v61, %v1093_v9 }
 0x132   : > { %v515_v63 = vpop.f32.mrf.mxu1  ;;  %989 = vrot.lane.b32.xlu0 %v988_v62, %s1086_s28  ;;  %984 = vrot.lane.b32.xlu2 %v988_v62, %s1089_s16 }
 0x13a   : > { %585 = vrot.lane.b32.xlu0 %v1093_v9, %s1089_s16  ;;  %557 = vrot.lane.b32.xlu2 %v1093_v9, %s1088_s15 }
 0x142   : > { %559 = vrot.lane.b32.xlu0 %v540_v61, %s1088_s15  ;;  %547 = vrot.lane.b32.xlu2 %v540_v61, %s1092_s25 }
 0x14a   : > { %455 = vrot.lane.b32.xlu0 %v1215_v6, %s1090_s18  ;;  %442 = vrot.lane.b32.xlu2 %v1215_v6, %s1087_s29  ;;  %s838_s29 = sshll.u32 %s337_s23, 3  ;;  %s1025_s18 = scalar_lea.hbm %s1499_s9, 16 }
 0x14b   : > { %s339_s26 = scalar_lea.vmem [#allocation2], %s838_s29 }
 0x152   : > { %429 = vrot.lane.b32.xlu0 %v1215_v6, %s1089_s16  ;;  %416 = vrot.lane.b32.xlu2 %v1215_v6, %s1086_s28  ;;  %s878_s16 = sshll.u32 %s1075_s12, 3  ;;  %s747_s12 = scalar_lea.sflag [#allocation3], %s337_s23 }
 0x15a   : > { %394 = vrot.lane.b32.xlu2 %v1210_v4, %s1092_s25 }
 0x162   : > { %549 = vrot.lane.b32.xlu2 %v1093_v9, %s1092_s25  ;;  %s758_s25 = scalar_lea.hbm %s1499_s9, %s878_s16 }
 0x163   : > { %s762_s27 = sshll.u32 %s758_s25, 4  ;;  %s763_s27 = int_to_ptr.hbm [resolvable:$true] %s762_s27 }
 0x18c   : > { %v985_v0 = vpop.permute.xlu2 %984 }
 0x18d   : > { %v987_v2 = vunpack.i.h.bf16 %v985_v0  ;;  %v986_v3 = vunpack.i.l.bf16 %v985_v0  ;;  %v722_v0 = vunpack.c.h.b16 %v1205_v1 }
 0x18f   : > { %v587_v5 = vsel %vm435_vm3, %v986_v3, %v987_v2 }
 0x190   : > { %v600_v7 = vpack.c.bf16 %v587_v5, %v587_v5  ;;  %v714_v5 = vld [vmem:[%s1497_s7] sm:$0xf] }
 0x192   : > { %v615_v8 = vsel %vm613_vm11, %v600_v7, 0  ;;  %v715_v7 = vld [vmem:[%s1498_s8] sm:$0xff] }
 0x193   : > { %628 = vmatpush.bf16.msra.mxu3 %v615_v8  ;;  %718 = vperm.xlu2 %1003, %v715_v7  }
 0x194   : > { %v558_v10 = vpop.permute.xlu2 %557 }
 0x195   : > { %v861_v29 = vpack.c.bf16 %v558_v10, %v1294_v47 }
 0x19c   : > { %v1337_v14 = vpop.permute.xlu2 %547 }
 0x19d   : > { %v551_v51 = vsel %vm396_vm8, %v1294_v47, %v1337_v14 }
 0x1a4   : > { %v990_v18 = vpop.permute.xlu0 %989  ;;  %v443_v20 = vpop.permute.xlu2 %442 }
 0x1a5   : > { %v992_v22 = vunpack.i.h.bf16 %v990_v18  ;;  %v991_v4 = vunpack.i.l.bf16 %v990_v18  ;;  %v449_v34 = vsel %vm448_vm1, %v443_v20, %v950_v15  ;;  %vm845_vm1 = vmneg %vm383_vm7  ;;  %vm724_vm7 = vcmask 64512  }
 0x1a7   : > { %v575_v24 = vsel %vm422_vm4, %v991_v4, %v992_v22  ;;  %v576_v40 = vsel %vm422_vm4, %v992_v22, %v1303_v49  ;;  %v686_v49 = vld [vmem:[%s1496_s6] sm:$0xff] }
 0x1a8   : > { %v597_v26 = vpack.c.bf16 %v575_v24, %v1093_v9  ;;  %v865_v45 = vpack.c.bf16 %v576_v40, %v531_v60 }
 0x1aa   : > { %629 = vmatpush.bf16.msra.mxu3 %v597_v26 }
 0x1ac   : > { %v586_v31 = vpop.permute.xlu0 %585  ;;  %v417_v32 = vpop.permute.xlu2 %416 }
 0x1ad   : > { %v588_v33 = vsel %vm435_vm3, %v987_v2, %v586_v31  ;;  %v423_v56 = vsel %vm422_vm4, %v417_v32, %v960_v23  ;;  %v592_v15 = vsel %vm435_vm3, %v586_v31, 0.0  ;;  %v723_v2 = vpack.c.b16 %v722_v0, %v722_v0 }
 0x1ae   : > { %v601_v35 = vpack.c.bf16 %v588_v33, %v588_v33  ;;  %862 = vmatpush.bf16.msk.msra.mxu3 %vm860_vm14, %v861_v29  ;;  %v602_v11 = vpack.c.bf16 %v592_v15, %v592_v15  ;;  %vm846_vm14 = vmpackc.low %vm1347_vm13, %vm845_vm1 }
 0x1af   : > { %v729_v3 = vsel %vm613_vm11, %v723_v2, 0 }
 0x1b0   : > { %v618_v37 = vsel %vm613_vm11, %v601_v35, 0  ;;  %v621_v16 = vsel %vm613_vm11, %v602_v11, 0  ;;  %v683_v35 = vld [vmem:[%s1495_s5] sm:$0xf] }
 0x1b1   : > { %863 = vmatmul.msk.bf16.vlgmr.msra.gmra.mxu3 %vm609_vm15, %v1360_v36 }
 0x1b2   : > { %641 = vmatpush.bf16.msrb.mxu3 %v618_v37 }
 0x1b4   : > { %v1370_v43 = vpop.permute.xlu0 %559  ;;  %v395_v44 = vpop.permute.xlu2 %394 }
 0x1b5   : > { %v563_v52 = vsel %vm409_vm6, %v558_v10, %v1370_v43  ;;  %v398_v53 = vsel %vm396_vm8, %v981_v39, %v395_v44 }
 0x1b6   : > { %866 = vmatpush.bf16.msk.msrb.mxu3 %vm864_vm5, %v865_v45  ;;  %v471_v54 = vpack.c.bf16 %v398_v53, %v385_v46  ;;  %v595_v55 = vpack.c.bf16 %v563_v52, %v551_v51 }
 0x1b8   : > { %524 = vmatpush.bf16.msra.mxu2 %v471_v54 }
 0x1ba   : > { %643 = vmatpush.bf16.msrb.mxu3 %v595_v55 }
 0x1bb   : > { %857 = vmatmul.msk.bf16.vlgmr.msra.gmra.mxu2 %vm487_vm9, %v1299_v48 }
 0x1bc   : > { %v456_v28 = vpop.permute.xlu0 %455  ;;  %738 = vmatpush.bf16.msrb.mxu2 %v729_v3  ;;  %v550_v24 = vpop.permute.xlu2 %549 }
 0x1bd   : > { %v462_v47 = vsel %vm461_vm0, %v456_v28, %v955_v21  ;;  %vm841_vm0 = vmpackc.low %vm1094_vm2, %vm1341_vm12  ;;  %v552_v29 = vsel %vm396_vm8, %v1337_v14, %v550_v24 }
 0x1be   : > { %v478_v38 = vpack.c.bf16 %v462_v47, %v449_v34 }
 0x1c0   : > { %495 = vmatpush.bf16.msra.mxu0 %v478_v38 }
 0x1c1   : > { %867 = vmatmul.msk.bf16.vlgmr.msrb.gmra.mxu3 %vm609_vm15, %v1360_v36 }
 0x1c4   : > { %v430_v39 = vpop.permute.xlu0 %429 }
 0x1c5   : > { %v436_v12 = vsel %vm435_vm3, %v430_v39, %v965_v19  ;;  %vm868_vm3 = vmpackc.low %vm422_vm4, %vm1094_vm2 }
 0x1c6   : > { %v475_v58 = vpack.c.bf16 %v436_v12, %v423_v56 }
 0x1c8   : > { %496 = vmatpush.bf16.msra.mxu0 %v475_v58 }
 0x1cb   : > { %876 = vmatmul.msk.bf16.vlgmr.msrb.gmra.mxu2 %vm724_vm7, %v714_v5 }
 0x1cc   : > { %843 = vmatpush.bf16.msk.msra.mxu0 %vm841_vm0, %v842_v17 }
 0x1d0   : > { %848 = vmatpush.bf16.msk.msra.mxu0 %vm846_vm14, %v1285_v42 }
 0x1d3   : > { %849 = vmatmul.msk.bf16.vlgmr.msra.gmra.mxu0 %vm487_vm9, %v1299_v48  ;;  %vm872_vm9 = vmpackc.low %vm369_vm10, %vm1094_vm2 }
 0x1d4   : > { %654 = vmatpush.bf16.msrb.mxu0 %v621_v16 }
 0x1d8   : > { %870 = vmatpush.bf16.msk.msrb.mxu0 %vm868_vm3, %v869_v13 }
 0x1ed   : > { %v719_v45 = vpop.permute.xlu2 %718 }
 0x234   : > { %v632_v6 = vpop.f32.mrf.mxu3 }
 0x23c   : > { %v634_v19 = vpop.f32.mrf.mxu3 }
 0x23e   : > { %v526_v21 = vpop.f32.mrf.mxu2 }
 0x244   : > { %v645_v23 = vpop.f32.mrf.mxu3 }
 0x245   : > { %v646_v30 = vadd.f32 %v645_v23, %v1305_v50 }
 0x246   : > { %v528_v42 = vpop.f32.mrf.mxu2 }
 0x247   : > { %v663_v59 = vmax.f32 %v646_v30, 0.0 }
 0x249   : > { %v666_v60 = vsel %vm369_vm10, %v663_v59, 0.0 }
 0x24a   : > { %v998_v61 = vpack.i.bf16 %v666_v60, %v1093_v9  ;;  %v993_v62 = vpack.i.bf16 0.0, %v666_v60 }
 0x24c   : > { %v647_v63 = vpop.f32.mrf.mxu3  ;;  %999 = vrot.lane.b32.xlu1 %v998_v61, %s1088_s15  ;;  %994 = vrot.lane.b32.xlu0 %v993_v62, %s1086_s28  ;;  %s760_s28 = sshll.u32 %s339_s26, 4  ;;  %s761_s28 = int_to_ptr.vmem [resolvable:$true] %s760_s28 }
 0x24e   : > { %v740_v37 = vpop.f32.mrf.mxu2 }
 0x250   : > { %v500_v48 = vpop.f32.mrf.mxu0 }
 0x254   : > { %689 = vperm.xlu1 %982, %v686_v49   ;;  %561 = vrot.lane.b32.xlu0 %v1093_v9, %s1088_s15  ;;  %s1019_s15 = sshra.s32 %s763_s27, 4  ;;  %s1020_s15 = int_to_ptr.hbm [resolvable:$true] %s1019_s15 }
 0x255   : > { %s1021_s20 = scalar_lea.hbm %s1020_s15, 8  ;;  %p1026_p1 = scmp.lt.s32.totalorder %s1020_s15, %s1499_s9 }
 0x256   : > { %v742_v40 = vpop.f32.mrf.mxu2  ;;  %p1022_p12 = scmp.ne.s32.totalorder %s1020_s15, %s1021_s20  ;;  %p1027_p2 = scmp.lt.s32.totalorder %s1025_s18, %s1021_s20 }
 0x258   : > { %v502_v50 = vpop.f32.mrf.mxu0  ;;  %p1023_p13 = pnand %p1022_p12, %p1185_p4  ;;  %p1028_p3 = por %p1027_p2, %p1026_p1 }
 0x25a   : > { %p1024_p0 = pneg %p1023_p13 }
 0x25c   : > { %p1029_p5 = pnand %p1028_p3, %p1024_p0 }
 0x2be   : > { %v1000_v8 = vpop.permute.xlu1 %999  ;;  %v995_v9 = vpop.permute.xlu0 %994 }
 0x2bf   : > { %v997_v10 = vunpack.i.h.bf16 %v995_v9  ;;  %v996_v18 = vunpack.i.l.bf16 %v995_v9  ;;  %v1002_v1 = vunpack.i.h.bf16 %v1000_v8  ;;  %v1001_v20 = vunpack.i.l.bf16 %v1000_v8 }
 0x2c1   : > { %v681_v22 = vsel %vm422_vm4, %v996_v18, %v997_v10  ;;  %v674_v26 = vsel %vm409_vm6, %v1001_v20, %v1002_v1  ;;  %vm692_vm4 = vcmask 195584  }
 0x2c2   : > { %v685_v4 = vpack.c.bf16 %v681_v22, %v681_v22  ;;  %v873_v32 = vpack.c.bf16 %v663_v59, %v674_v26 }
 0x2c4   : > { %v697_v25 = vsel %vm613_vm11, %v685_v4, 0 }
 0x2c5   : > { %705 = vmatpush.bf16.msrb.mxu1 %v697_v25 }
 0x2c6   : > { %v562_v27 = vpop.permute.xlu0 %561  ;;  %v690_v14 = vpop.permute.xlu1 %689 }
 0x2c7   : > { %v564_v31 = vsel %vm409_vm6, %v1370_v43, %v562_v27 }
 0x2c8   : > { %v596_v33 = vpack.c.bf16 %v564_v31, %v552_v29 }
 0x2c9   : > { %874 = vmatpush.bf16.msk.msrb.mxu1 %vm872_vm9, %v873_v32 }
 0x2ca   : > { %656 = vmatpush.bf16.msrb.mxu0 %v596_v33 }
 0x2cc   : > { %875 = vmatmul.msk.bf16.vlgmr.msrb.gmra.mxu1 %vm692_vm4, %v683_v35 }
 0x2cd   : > { %871 = vmatmul.msk.bf16.vlgmr.msrb.gmra.mxu0 %vm609_vm15, %v1360_v36  ;;  %v741_v36 = vadd.f32 %v740_v37, %v719_v45 }
 0x349   : > { %v708_v41 = vpop.f32.mrf.mxu1 }
 0x34a   : > { %v709_v43 = vadd.f32 %v708_v41, %v690_v14  ;;  %v658_v44 = vpop.f32.mrf.mxu0 }
 0x34c   : > { %v712_v46 = vmax.f32 %v709_v43, 0.0 }
 0x34e   : > { %v713_v51 = vsel %vm369_vm10, %v712_v46, 0.0 }
 0x34f   : > { %v744_v52 = vadd.f32 %v741_v36, %v713_v51 }
 0x351   : > { %v710_v53 = vpop.f32.mrf.mxu1  ;;  %745 = vst [vmem:[%s339_s26] sm:$0xff] %v744_v52 }
 0x352   : > { %v660_v54 = vpop.f32.mrf.mxu0 }
 0x353   : > { %1032 = shalt.err (!%p1029_p5)
}
 0x354   : > { %882 = dma.vmem_to_hbm [thread:$0]  (%p1185_p4), %s761_s28, 128, %s763_s27, %s747_s12  }
 0x355 PF: > { %p888_p6 = scmp.ge.s32.totalorder %s1083_s14, 2  ;;  %s774_s23 = sand.u32 1, %s1063_s30  }
 0x356   : > { %s775_s26 = scalar_lea.sflag [#allocation3], %s774_s23 }
 0x357   : > { %p885_p7 = pnand %p888_p6, %p1192_p8 }
 0x359   : > { %p886_p9 = pneg %p885_p7 }
 0x35b   : > { %1058 = dma.done.wait (%p886_p9), %s775_s26, 128  }
 0x35c   : > { %1060 = vsyncadd (%p886_p9), %s775_s26, 4294967168  ;;  %s22_s14 = sadd.s32 1, %s1083_s14   ;;  %s1506_s30 = smov %s1067_s10 }
 0x35d   : > { %p19_p10 = scmp.ge.s32.totalorder %s22_s14, 4   ;;  %s1507_s10 = smov %s1071_s11 }
 0x35e   : > { %s1508_s11 = smov %s1198_s22  ;;  %s1509_s12 = smov %s1079_s13 }
 0x35f   : > { %s1510_s13 = smov %s1512_s17  ;;  %21 = sbr.rel (!%p19_p10) target bundleno = 4 (0x4), region = 92 }
 0x364   :  { %781 = vsyncpa [#allocation3], 1 }
 0x365   :  { %783 = vsyncpa [#allocation3 + $0x1], 1 }

</bundles_post_ra>
